<compile_context>
chip_gen: v7x
topology: tpu7x:2x2x1
jax: 0.10.0
libtpu: 0.0.40
codegen_flags: <defaults>
</compile_context>

<pallas_src>
import functools

import jax
import jax.numpy as jnp
from jax import lax
from jax.experimental import pallas as pl
from jax.experimental.pallas import tpu as pltpu


def _round_up(a, b):
    return ((a + b - 1) // b) * b


def _selective_updater_kernel(u_ref, x_ref, w1_ref, g1_ref, b1_ref,
                              w2u_ref, w2x_ref, b2u_ref, b2x_ref, o_ref,
                              *, inv_h):
    """One row-tile of the Selective_updater forward.

    u_ref, x_ref    : (tm, Dp)  update_feat / input_feat rows (I/O dtype)
    w1_ref          : (Dp, Hp)  fc1 weight (matmul dtype, e.g. bf16)
    g1_ref, b1_ref  : (1, Hp)   LayerNorm(H) gamma / beta (f32, zero-padded)
    w2u_ref         : (Hp, Dp)  fc2 weight, update-gate half (matmul dtype)
    w2x_ref         : (Hp, Dp)  fc2 weight, input-gate half  (matmul dtype)
    b2u_ref, b2x_ref: (1, Dp)   fc2 bias halves (f32)
    o_ref           : (tm, Dp)
    """
    uf = u_ref[...].astype(jnp.float32)
    xf = x_ref[...].astype(jnp.float32)

    # d = update_feat + input_feat  (add in f32, cast once for the MXU)
    s = (uf + xf).astype(w1_ref.dtype)

    # fc1 (no bias): MXU with low-precision operands, f32 accumulation.
    h = jnp.dot(s, w1_ref[...], preferred_element_type=jnp.float32)

    # LayerNorm(H) — one-pass statistics: E[h], E[h^2] in a single sweep.
    # Padded H columns of h are exact zeros, so sums over Hp equal sums over H;
    # inv_h = 1/H (real H) keeps the statistics correct.
    s1 = jnp.sum(h, axis=-1, keepdims=True)
    s2 = jnp.sum(h * h, axis=-1, keepdims=True)
    mu = s1 * inv_h
    var = jnp.maximum(s2 * inv_h - mu * mu, 0.0)
    hn = (h - mu) * lax.rsqrt(var + 1e-5)
    hn = hn * g1_ref[...] + b1_ref[...]     # padded columns -> exactly 0

    # ReLU, then back to the matmul dtype for fc2.
    hr = jnp.maximum(hn, 0.0).astype(w2u_ref.dtype)

    # fc2 split per gate: both gate blocks come out lane-aligned, no lane slice.
    gu = jnp.dot(hr, w2u_ref[...], preferred_element_type=jnp.float32)
    gx = jnp.dot(hr, w2x_ref[...], preferred_element_type=jnp.float32)
    gu = jax.nn.sigmoid(gu + b2u_ref[...])
    gx = jax.nn.sigmoid(gx + b2x_ref[...])

    # Gated combine in f32, single cast to the output dtype.
    o_ref[...] = (uf * gu + xf * gx).astype(o_ref.dtype)


def selective_updater(update_feat, input_feat, params,
                      matmul_dtype=jnp.bfloat16):
    """JAX wrapper. update_feat / input_feat: (num_p, B, D)."""
    # TODO(synk): for tiny deployment sizes (D=32, H=8) a plain-XLA fusion or a
    # pure-VPU formulation would beat the MXU path; this kernel targets the
    # realistic D >= 128 regime.
    w1, gamma1, beta1, w2, b2 = params
    num_p, B, D = update_feat.shape
    H = w1.shape[1]
    N = num_p * B

    mm_dt = jnp.dtype(matmul_dtype)
    io_dt = jnp.dtype(update_feat.dtype)

    # ---- lane-dense feature / hidden padding ---------------------------------
    Dp = _round_up(D, 128)
    Hp = _round_up(H, 128)
    pad_d = Dp - D
    pad_h = Hp - H

    u2 = update_feat.reshape(N, D)
    x2 = input_feat.reshape(N, D)
    if pad_d:
        u2 = jnp.pad(u2, ((0, 0), (0, pad_d)))
        x2 = jnp.pad(x2, ((0, 0), (0, pad_d)))

    # fc1 weight: pad contraction rows (zero rows -> no contribution) and
    # output columns (zero columns -> h padded columns exactly 0).
    w1p = jnp.pad(w1, ((0, pad_d), (0, pad_h))) if (pad_d or pad_h) else w1
    w1p = w1p.astype(mm_dt)

    # LayerNorm params zero-padded so padded LN outputs are exactly 0.
    g1 = jnp.pad(gamma1.reshape(1, H).astype(jnp.float32), ((0, 0), (0, pad_h)))
    be1 = jnp.pad(beta1.reshape(1, H).astype(jnp.float32), ((0, 0), (0, pad_h)))

    # fc2 weight split per gate; pad contraction rows and output columns with
    # zeros (padded gate columns multiply zero-padded u/x columns -> inert).
    w2u = w2[:, :D]
    w2x = w2[:, D:]
    b2u = b2[:D].reshape(1, D)
    b2x = b2[D:].reshape(1, D)
    if pad_d or pad_h:
        w2u = jnp.pad(w2u, ((0, pad_h), (0, pad_d)))
        w2x = jnp.pad(w2x, ((0, pad_h), (0, pad_d)))
        b2u = jnp.pad(b2u, ((0, 0), (0, pad_d)))
        b2x = jnp.pad(b2x, ((0, 0), (0, pad_d)))
    w2u = w2u.astype(mm_dt)
    w2x = w2x.astype(mm_dt)
    b2u = b2u.astype(jnp.float32)
    b2x = b2x.astype(jnp.float32)

    # ---- row tiling (pipelining + v7x megacore) ------------------------------
    # Keep double-buffered row traffic (u, x, out) under ~16 MiB of VMEM.
    row_budget = 16 << 20
    tm_cap = max(8, (row_budget // (6 * Dp * io_dt.itemsize)) // 8 * 8)
    tm_cap = min(512, tm_cap)
    tm = min(tm_cap, _round_up(N, 8))
    if N > 8 and tm >= N:
        # Prefer >= 2 grid steps so DMA pipelines and both v7x TCs get work.
        tm = _round_up(pl.cdiv(N, 2), 8)
    N_pad = _round_up(N, tm)
    if N_pad != N:
        u2 = jnp.pad(u2, ((0, N_pad - N), (0, 0)))
        x2 = jnp.pad(x2, ((0, N_pad - N), (0, 0)))
    grid_rows = N_pad // tm

    # ---- VMEM budget (keep portable to v7x's 64 MiB) -------------------------
    w_bytes = (Dp * Hp + 2 * Hp * Dp) * mm_dt.itemsize
    ln_bytes = (2 * Hp + 2 * Dp) * 4
    io_bytes = 3 * tm * Dp * io_dt.itemsize
    vmem_est = 2 * (w_bytes + ln_bytes + io_bytes) + (2 << 20)
    vmem_limit = int(min(48 << 20, max(32 << 20, vmem_est)))

    kernel = functools.partial(_selective_updater_kernel, inv_h=1.0 / H)

    out = pl.pallas_call(
        kernel,
        out_shape=jax.ShapeDtypeStruct((N_pad, Dp), update_feat.dtype),
        grid_spec=pltpu.PrefetchScalarGridSpec(
            num_scalar_prefetch=0,
            grid=(grid_rows,),
            in_specs=[
                pl.BlockSpec((tm, Dp), lambda i: (i, 0)),    # update_feat rows
                pl.BlockSpec((tm, Dp), lambda i: (i, 0)),    # input_feat rows
                pl.BlockSpec((Dp, Hp), lambda i: (0, 0)),    # fc1 weight
                pl.BlockSpec((1, Hp), lambda i: (0, 0)),     # LN gamma
                pl.BlockSpec((1, Hp), lambda i: (0, 0)),     # LN beta
                pl.BlockSpec((Hp, Dp), lambda i: (0, 0)),    # fc2 weight (gate_u)
                pl.BlockSpec((Hp, Dp), lambda i: (0, 0)),    # fc2 weight (gate_x)
                pl.BlockSpec((1, Dp), lambda i: (0, 0)),     # fc2 bias (gate_u)
                pl.BlockSpec((1, Dp), lambda i: (0, 0)),     # fc2 bias (gate_x)
            ],
            out_specs=pl.BlockSpec((tm, Dp), lambda i: (i, 0)),
        ),
        compiler_params=pltpu.CompilerParams(
            dimension_semantics=("parallel",),
            vmem_limit_bytes=vmem_limit),
    )(u2, x2, w1p, g1, be1, w2u, w2x, b2u, b2x)

    return out[:N, :D].reshape(num_p, B, D)


def init_params(key, input_dim, scale_factor=4, dtype=jnp.float32):
    """Deterministic synthetic parameters matching Selective_updater.__init__.

    fc3 / norm_fc3 are defined in __init__ but unused in forward -> omitted.
    """
    D = input_dim
    H = D // scale_factor
    k1, k2, k3 = jax.random.split(key, 3)
    # fc1: Linear(D, H, bias=False); stored transposed as (D, H)
    w1 = (jax.random.normal(k1, (D, H), dtype) * 0.1).astype(dtype)
    # LayerNorm(H) default init: gamma=1, beta=0
    gamma1 = jnp.ones((H,), dtype)
    beta1 = jnp.zeros((H,), dtype)
    # fc2: Linear(H, 2D, bias=True); stored transposed as (H, 2D)
    w2 = (jax.random.normal(k2, (H, 2 * D), dtype) * 0.1).astype(dtype)
    b2 = (jax.random.normal(k3, (2 * D,), dtype) * 0.1).astype(dtype)
    return (w1, gamma1, beta1, w2, b2)


def _reference(update_feat, input_feat, params):
    """Plain-JAX f32 reference of the PyTorch forward, for sanity checking."""
    w1, gamma1, beta1, w2, b2 = params
    d = update_feat + input_feat
    h = d @ w1
    mu = h.mean(-1, keepdims=True)
    var = ((h - mu) ** 2).mean(-1, keepdims=True)
    h = (h - mu) / jnp.sqrt(var + 1e-5) * gamma1 + beta1
    h = jax.nn.relu(h)
    g = h @ w2 + b2
    num_p, B, D = update_feat.shape
    g = jax.nn.sigmoid(g.reshape(num_p, B, 2, D))
    return update_feat * g[:, :, 0, :] + input_feat * g[:, :, 1, :]


if __name__ == "__main__":
    key = jax.random.PRNGKey(0)

    # ---- test 1: tiny shape (heavy padding path) ----------------------------
    num_p, B, D = 8, 2, 32  # D divisible by scale_factor=4
    kp, ku, kx, kp2, ku2, kx2 = jax.random.split(key, 6)

    params = init_params(kp, D, scale_factor=4)
    update_feat = jax.random.normal(ku, (num_p, B, D), jnp.float32)
    input_feat = jax.random.normal(kx, (num_p, B, D), jnp.float32)
    ref = _reference(update_feat, input_feat, params)

    # Exactness check: f32 matmul path vs plain-JAX f32 reference.
    out_f32 = selective_updater(update_feat, input_feat, params,
                                matmul_dtype=jnp.float32)
    out_f32 = jax.block_until_ready(out_f32)
    assert out_f32.shape == (num_p, B, D)
    assert jnp.allclose(out_f32, ref, atol=2e-4, rtol=2e-4)

    # Default fast path: bf16 MXU operands, f32 accumulation.
    out_bf16 = selective_updater(update_feat, input_feat, params)
    out_bf16 = jax.block_until_ready(out_bf16)
    assert out_bf16.shape == (num_p, B, D)
    assert jnp.allclose(out_bf16, ref, atol=5e-2, rtol=5e-2)

    # ---- test 2: lane-aligned D (no D-padding, H padded to 128) -------------
    D2 = 256
    params2 = init_params(kp2, D2, scale_factor=4)
    u_big = jax.random.normal(ku2, (num_p, B, D2), jnp.float32)
    x_big = jax.random.normal(kx2, (num_p, B, D2), jnp.float32)
    ref2 = _reference(u_big, x_big, params2)

    out2_f32 = selective_updater(u_big, x_big, params2,
                                 matmul_dtype=jnp.float32)
    out2_f32 = jax.block_until_ready(out2_f32)
    assert out2_f32.shape == (num_p, B, D2)
    assert jnp.allclose(out2_f32, ref2, atol=1e-3, rtol=1e-3)

    out2_bf16 = selective_updater(u_big, x_big, params2)
    out2_bf16 = jax.block_until_ready(out2_bf16)
    assert out2_bf16.shape == (num_p, B, D2)
    assert jnp.allclose(out2_bf16, ref2, atol=5e-2, rtol=5e-2)

    print("KERNEL_OK")
</pallas_src>

<mosaic_0001>
module attributes {stable_mosaic.version = 11 : i64} {
  func.func @_selective_updater_kernel(%arg0: i32, %arg1: memref<8x128xf32, #tpu.memory_space<vmem>>, %arg2: memref<8x128xf32, #tpu.memory_space<vmem>>, %arg3: memref<128x128xf32, #tpu.memory_space<vmem>>, %arg4: memref<1x128xf32, #tpu.memory_space<vmem>>, %arg5: memref<1x128xf32, #tpu.memory_space<vmem>>, %arg6: memref<128x128xf32, #tpu.memory_space<vmem>>, %arg7: memref<128x128xf32, #tpu.memory_space<vmem>>, %arg8: memref<1x128xf32, #tpu.memory_space<vmem>>, %arg9: memref<1x128xf32, #tpu.memory_space<vmem>>, %arg10: memref<8x128xf32, #tpu.memory_space<vmem>>) attributes {dimension_semantics = [#tpu.dimension_semantics<parallel>], iteration_bounds = array<i64: 2>, scalar_prefetch = 0 : i64, scratch_operands = 0 : i64, tpu.core_type = #tpu.core_type<tc>, window_params = [{transform_indices = @transform_0, window_bounds = array<i64: 8, 128>}, {transform_indices = @transform_1, window_bounds = array<i64: 8, 128>}, {pipeline_mode = #tpu.pipeline_mode<synchronous>, transform_indices = @transform_2, window_bounds = array<i64: 128, 128>}, {pipeline_mode = #tpu.pipeline_mode<synchronous>, transform_indices = @transform_3, window_bounds = array<i64: 1, 128>}, {pipeline_mode = #tpu.pipeline_mode<synchronous>, transform_indices = @transform_4, window_bounds = array<i64: 1, 128>}, {pipeline_mode = #tpu.pipeline_mode<synchronous>, transform_indices = @transform_5, window_bounds = array<i64: 128, 128>}, {pipeline_mode = #tpu.pipeline_mode<synchronous>, transform_indices = @transform_6, window_bounds = array<i64: 128, 128>}, {pipeline_mode = #tpu.pipeline_mode<synchronous>, transform_indices = @transform_7, window_bounds = array<i64: 1, 128>}, {pipeline_mode = #tpu.pipeline_mode<synchronous>, transform_indices = @transform_8, window_bounds = array<i64: 1, 128>}, {transform_indices = @transform_9, window_bounds = array<i64: 8, 128>}]} {
    %c0 = arith.constant 0 : index
    %c0_0 = arith.constant 0 : index
    %0 = vector.load %arg1[%c0, %c0_0] : memref<8x128xf32, #tpu.memory_space<vmem>>, vector<8x128xf32>
    %c0_1 = arith.constant 0 : index
    %c0_2 = arith.constant 0 : index
    %1 = vector.load %arg2[%c0_1, %c0_2] : memref<8x128xf32, #tpu.memory_space<vmem>>, vector<8x128xf32>
    %2 = arith.addf %0, %1 : vector<8x128xf32>
    %c0_3 = arith.constant 0 : index
    %c0_4 = arith.constant 0 : index
    %3 = vector.load %arg3[%c0_3, %c0_4] : memref<128x128xf32, #tpu.memory_space<vmem>>, vector<128x128xf32>
    %cst = arith.constant dense<0.000000e+00> : vector<8x128xf32>
    %4 = tpu.matmul %2, %3, %cst {dimension_numbers = #tpu.dot_dimension_numbers<[1], [0], [0], [1], [0, 0, 1, 1], [], []>} : vector<8x128xf32>, vector<128x128xf32>, vector<8x128xf32> -> vector<8x128xf32>
    %cst_5 = arith.constant dense<0.000000e+00> : vector<8xf32>
    %5 = vector.multi_reduction <add>, %4, %cst_5 [1] : vector<8x128xf32> to vector<8xf32>
    %6 = vector.shape_cast %5 : vector<8xf32> to vector<8x1xf32>
    %7 = arith.mulf %4, %4 : vector<8x128xf32>
    %cst_6 = arith.constant dense<0.000000e+00> : vector<8xf32>
    %8 = vector.multi_reduction <add>, %7, %cst_6 [1] : vector<8x128xf32> to vector<8xf32>
    %9 = vector.shape_cast %8 : vector<8xf32> to vector<8x1xf32>
    %cst_7 = arith.constant 1.250000e-01 : f32
    %10 = vector.broadcast %cst_7 : f32 to vector<8x1xf32>
    %11 = arith.mulf %6, %10 : vector<8x1xf32>
    %cst_8 = arith.constant 1.250000e-01 : f32
    %12 = vector.broadcast %cst_8 : f32 to vector<8x1xf32>
    %13 = arith.mulf %9, %12 : vector<8x1xf32>
    %14 = arith.mulf %11, %11 : vector<8x1xf32>
    %15 = arith.subf %13, %14 : vector<8x1xf32>
    %cst_9 = arith.constant 0.000000e+00 : f32
    %16 = vector.broadcast %cst_9 : f32 to vector<8x1xf32>
    %17 = arith.maximumf %15, %16 : vector<8x1xf32>
    %18 = vector.broadcast %11 : vector<8x1xf32> to vector<8x128xf32>
    %19 = arith.subf %4, %18 : vector<8x128xf32>
    %cst_10 = arith.constant 9.99999974E-6 : f32
    %20 = vector.broadcast %cst_10 : f32 to vector<8x1xf32>
    %21 = arith.addf %17, %20 : vector<8x1xf32>
    %22 = math.rsqrt %21 : vector<8x1xf32>
    %23 = vector.broadcast %22 : vector<8x1xf32> to vector<8x128xf32>
    %24 = arith.mulf %19, %23 : vector<8x128xf32>
    %c0_11 = arith.constant 0 : index
    %c0_12 = arith.constant 0 : index
    %25 = vector.load %arg4[%c0_11, %c0_12] : memref<1x128xf32, #tpu.memory_space<vmem>>, vector<1x128xf32>
    %26 = vector.broadcast %25 : vector<1x128xf32> to vector<8x128xf32>
    %27 = arith.mulf %24, %26 : vector<8x128xf32>
    %c0_13 = arith.constant 0 : index
    %c0_14 = arith.constant 0 : index
    %28 = vector.load %arg5[%c0_13, %c0_14] : memref<1x128xf32, #tpu.memory_space<vmem>>, vector<1x128xf32>
    %29 = vector.broadcast %28 : vector<1x128xf32> to vector<8x128xf32>
    %30 = arith.addf %27, %29 : vector<8x128xf32>
    %cst_15 = arith.constant 0.000000e+00 : f32
    %31 = vector.broadcast %cst_15 : f32 to vector<8x128xf32>
    %32 = arith.maximumf %30, %31 : vector<8x128xf32>
    %c0_16 = arith.constant 0 : index
    %c0_17 = arith.constant 0 : index
    %33 = vector.load %arg6[%c0_16, %c0_17] : memref<128x128xf32, #tpu.memory_space<vmem>>, vector<128x128xf32>
    %cst_18 = arith.constant dense<0.000000e+00> : vector<8x128xf32>
    %34 = tpu.matmul %32, %33, %cst_18 {dimension_numbers = #tpu.dot_dimension_numbers<[1], [0], [0], [1], [0, 0, 1, 1], [], []>} : vector<8x128xf32>, vector<128x128xf32>, vector<8x128xf32> -> vector<8x128xf32>
    %c0_19 = arith.constant 0 : index
    %c0_20 = arith.constant 0 : index
    %35 = vector.load %arg7[%c0_19, %c0_20] : memref<128x128xf32, #tpu.memory_space<vmem>>, vector<128x128xf32>
    %cst_21 = arith.constant dense<0.000000e+00> : vector<8x128xf32>
    %36 = tpu.matmul %32, %35, %cst_21 {dimension_numbers = #tpu.dot_dimension_numbers<[1], [0], [0], [1], [0, 0, 1, 1], [], []>} : vector<8x128xf32>, vector<128x128xf32>, vector<8x128xf32> -> vector<8x128xf32>
    %c0_22 = arith.constant 0 : index
    %c0_23 = arith.constant 0 : index
    %37 = vector.load %arg8[%c0_22, %c0_23] : memref<1x128xf32, #tpu.memory_space<vmem>>, vector<1x128xf32>
    %38 = vector.broadcast %37 : vector<1x128xf32> to vector<8x128xf32>
    %39 = arith.addf %34, %38 : vector<8x128xf32>
    %40 = arith.negf %39 : vector<8x128xf32>
    %41 = math.exp %40 : vector<8x128xf32>
    %cst_24 = arith.constant 1.000000e+00 : f32
    %42 = vector.broadcast %cst_24 : f32 to vector<8x128xf32>
    %43 = arith.addf %42, %41 : vector<8x128xf32>
    %44 = arith.divf %42, %43 : vector<8x128xf32>
    %c0_25 = arith.constant 0 : index
    %c0_26 = arith.constant 0 : index
    %45 = vector.load %arg9[%c0_25, %c0_26] : memref<1x128xf32, #tpu.memory_space<vmem>>, vector<1x128xf32>
    %46 = vector.broadcast %45 : vector<1x128xf32> to vector<8x128xf32>
    %47 = arith.addf %36, %46 : vector<8x128xf32>
    %48 = arith.negf %47 : vector<8x128xf32>
    %49 = math.exp %48 : vector<8x128xf32>
    %cst_27 = arith.constant 1.000000e+00 : f32
    %50 = vector.broadcast %cst_27 : f32 to vector<8x128xf32>
    %51 = arith.addf %50, %49 : vector<8x128xf32>
    %52 = arith.divf %50, %51 : vector<8x128xf32>
    %53 = arith.mulf %0, %44 : vector<8x128xf32>
    %54 = arith.mulf %1, %52 : vector<8x128xf32>
    %55 = arith.addf %53, %54 : vector<8x128xf32>
    %c0_28 = arith.constant 0 : index
    %c0_29 = arith.constant 0 : index
    %56 = vector.load %arg10[%c0_28, %c0_29] : memref<8x128xf32, #tpu.memory_space<vmem>>, vector<8x128xf32>
    tpu.vector_store %arg10[%c0_28, %c0_29], %55 {strides = array<i32>} : memref<8x128xf32, #tpu.memory_space<vmem>>, vector<8x128xf32>,
    return
  }
  func.func @transform_0(%arg0: i32) -> (i32, i32) {
    %c0_i32 = arith.constant 0 : i32
    %c0_i32_0 = arith.constant 0 : i32
    return %arg0, %c0_i32 : i32, i32
  }
  func.func @transform_1(%arg0: i32) -> (i32, i32) {
    %c0_i32 = arith.constant 0 : i32
    %c0_i32_0 = arith.constant 0 : i32
    return %arg0, %c0_i32 : i32, i32
  }
  func.func @transform_2(%arg0: i32) -> (i32, i32) {
    %c0_i32 = arith.constant 0 : i32
    %c0_i32_0 = arith.constant 0 : i32
    %c0_i32_1 = arith.constant 0 : i32
    return %c0_i32, %c0_i32_0 : i32, i32
  }
  func.func @transform_3(%arg0: i32) -> (i32, i32) {
    %c0_i32 = arith.constant 0 : i32
    %c0_i32_0 = arith.constant 0 : i32
    %c0_i32_1 = arith.constant 0 : i32
    return %c0_i32, %c0_i32_0 : i32, i32
  }
  func.func @transform_4(%arg0: i32) -> (i32, i32) {
    %c0_i32 = arith.constant 0 : i32
    %c0_i32_0 = arith.constant 0 : i32
    %c0_i32_1 = arith.constant 0 : i32
    return %c0_i32, %c0_i32_0 : i32, i32
  }
  func.func @transform_5(%arg0: i32) -> (i32, i32) {
    %c0_i32 = arith.constant 0 : i32
    %c0_i32_0 = arith.constant 0 : i32
    %c0_i32_1 = arith.constant 0 : i32
    return %c0_i32, %c0_i32_0 : i32, i32
  }
  func.func @transform_6(%arg0: i32) -> (i32, i32) {
    %c0_i32 = arith.constant 0 : i32
    %c0_i32_0 = arith.constant 0 : i32
    %c0_i32_1 = arith.constant 0 : i32
    return %c0_i32, %c0_i32_0 : i32, i32
  }
  func.func @transform_7(%arg0: i32) -> (i32, i32) {
    %c0_i32 = arith.constant 0 : i32
    %c0_i32_0 = arith.constant 0 : i32
    %c0_i32_1 = arith.constant 0 : i32
    return %c0_i32, %c0_i32_0 : i32, i32
  }
  func.func @transform_8(%arg0: i32) -> (i32, i32) {
    %c0_i32 = arith.constant 0 : i32
    %c0_i32_0 = arith.constant 0 : i32
    %c0_i32_1 = arith.constant 0 : i32
    return %c0_i32, %c0_i32_0 : i32, i32
  }
  func.func @transform_9(%arg0: i32) -> (i32, i32) {
    %c0_i32 = arith.constant 0 : i32
    %c0_i32_0 = arith.constant 0 : i32
    return %arg0, %c0_i32 : i32, i32
  }
}

</mosaic_0001>

<bundles_post_ra>
// kernel: tpu_custom_call.1
= control target key start
LH: loop header
LB: loop body
LE: loop exit
PB: predicated region body
PF: predicated region fallthrough
CT: control target
= control target key end

     0   :  { %s1881_s0 = inlined_call_operand.hbm [shape: f32[16,128], index: 0, kind: input, shape index: {}]   ;;  %s1882_s1 = inlined_call_operand.hbm [shape: f32[16,128], index: 1, kind: input, shape index: {}]   ;;  %s1883_s2 = inlined_call_operand.hbm [shape: f32[128,128], index: 2, kind: input, shape index: {}]   ;;  %s1884_s3 = inlined_call_operand.vmem [shape: f32[1,128], index: 3, kind: input, shape index: {}]   ;;  %s1885_s4 = inlined_call_operand.vmem [shape: f32[1,128], index: 4, kind: input, shape index: {}]   ;;  %s1886_s5 = inlined_call_operand.hbm [shape: f32[128,128], index: 5, kind: input, shape index: {}]   ;;  %s1887_s6 = inlined_call_operand.hbm [shape: f32[128,128], index: 6, kind: input, shape index: {}]   ;;  %s1888_s7 = inlined_call_operand.vmem [shape: f32[1,128], index: 7, kind: input, shape index: {}]   ;;  %s1889_s8 = inlined_call_operand.vmem [shape: f32[1,128], index: 8, kind: input, shape index: {}]   ;;  %s1890_s9 = inlined_call_operand.hbm [shape: f32[16,128], index: 9, kind: output, shape index: {}]  }
   0x1   :  { %1898 = sst [smem:[#allocation19_spill]] %s1883_s2 }
   0x2   :  { %1899 = sst [smem:[#allocation20_spill]] %s1886_s5 }
   0x3   :  { %1900 = sst [smem:[#allocation21_spill]] %s1887_s6 }
   0x4   :  { %1901 = sst [smem:[#allocation22_spill]] %s1890_s9 }
   0x5   :  { %14 = vsyncpa [#allocation3], 0 }
   0x6   :  { %16 = vsyncpa [#allocation3 + $0x1], 0 }
   0x7   :  { %17 = vsyncpa [#allocation6], 0 }
   0x8   :  { %19 = vsyncpa [#allocation6 + $0x1], 0 }
   0x9   :  { %20 = vsyncpa [#allocation9], 0 }
   0xa   :  { %21 = vsyncpa [#allocation4], 0 }
   0xb   :  { %23 = vsyncpa [#allocation4 + $0x1], 0  ;;  %s1522_s30 = smov 0   ;;  %s1524_s10 = smov 0  }
   0xc   :  { %s1526_s11 = smov 0   ;;  %s1528_s12 = smov 0  }
   0xd LB: > { %1902 = sst [smem:[#allocation17_spill]] %s1447_s30  ;;  %s1543_s13 = sadd.s32 4294967295, %s1459_s12   ;;  %s1459_s12 = sphi %s1528_s12, %s1930_s12   ;;  %s1455_s11 = sphi %s1526_s11, %s1929_s11   ;;  %s1451_s10 = sphi %s1524_s10, %s1928_s10   ;;  %s1447_s30 = sphi %s1522_s30, %s1927_s30  }
   0xe   : > { %s885_s14 = sadd.s32 4294967294, %s1459_s12   ;;  %p49_p0 = scmp.ne.s32.totalorder %s1451_s10, %s1447_s30 }
   0xf   : > { %p1891_p1 = scmp.eq.s32.totalorder %s1543_s13, 0  ;;  %p252_p3 = scmp.eq.s32.totalorder %s885_s14, 1 }
  0x10   : > { %p886_p5 = scmp.ge.s32.totalorder %s1459_s12, 1  ;;  %p259_p7 = scmp.lt.s32.totalorder %s1459_s12, 3 }
  0x11   : > { %p1552_p4 = por %p1891_p1, %p49_p0  ;;  %p1557_p6 = por %p252_p3, %p49_p0 }
  0x12   : > { %p1562_p8 = pnand %p886_p5, %p259_p7  ;;  %s1461_s18 = smov [#allocation7]  }
  0x13   : > { %s1903_s15 = scalar_select %p1552_p4, 1, 0 }
  0x14   : > { %s1904_s16 = scalar_select %p1557_p6, 1, 0 }
  0x15   : > { %s1906_s17 = scalar_select %p1562_p8, 1, 0 }
  0x16   : > { %1905 = sst [smem:[#allocation18_spill]] %s1904_s16  ;;  %s271_s19 = sshll.u32 %s1461_s18, 4  ;;  %s1566_s19 = int_to_ptr.vmem [resolvable:$true] %s271_s19 }
  0x17   : > { %p1158_p9 = pneg %p1562_p8  ;;  %s1462_s21 = smov [#allocation8]  }
  0x18   : > { %s290_s22 = sshll.u32 %s1462_s21, 4  ;;  %s1463_s23 = smov [#allocation10]   ;;  %s1577_s22 = int_to_ptr.vmem [resolvable:$true] %s290_s22 }
  0x19   : > { %p1573_p11 = pnand %p1158_p9, %p1891_p1  ;;  %s1579_s24 = sshll.u32 %s1463_s23, 4  ;;  %s304_s24 = int_to_ptr.vmem [resolvable:$true] %s1579_s24 }
  0x1a   : > { %s1908_s2 = sld [smem:[#allocation19_spill]] }
  0x1b   : > { %p1589_p13 = pneg %p1573_p11 }
  0x20   : > { %s1237_s27 = scalar_lea.hbm %s1908_s2, 2048 }
  0x21   : > { %p1238_p12 = scmp.ne.s32.totalorder %s1908_s2, %s1237_s27  ;;  %p1244_p5 = scmp.lt.u32.totalorder %s1237_s27, %s1908_s2 }
  0x23   : > { %p1240_p0 = pnand %p1589_p13, %p1238_p12 }
  0x25   : > { %p1241_p3 = pneg %p1240_p0 }
  0x27   : > { %p1246_p7 = pnand %p1244_p5, %p1241_p3 }
  0x29   : > { %1249 = shalt.err (!%p1246_p7)
}
  0x2a   : > { %s1250_s23 = scalar_lea.vmem %s1566_s19, 2048  ;;  %p1258_p2 = scmp.lt.s32.totalorder %s1566_s19, %s1566_s19 }
  0x2b   : > { %p1251_p9 = scmp.ne.s32.totalorder %s1566_s19, %s1250_s23  ;;  %p1259_p6 = scmp.lt.s32.totalorder %s1250_s23, %s1250_s23 }
  0x2d   : > { %p1253_p10 = pnand %p1251_p9, %p1589_p13  ;;  %p1260_p12 = por %p1259_p6, %p1258_p2 }
  0x2f   : > { %p1254_p1 = pneg %p1253_p10 }
  0x31   : > { %p1261_p0 = pnand %p1260_p12, %p1254_p1 }
  0x33   : > { %1264 = shalt.err (!%p1261_p0)
}
  0x34   : > { %s1464_s25 = smov 128   ;;  %s1465_s26 = smov 8  }
  0x35   : > { %1161 = dma.hbm_to_vmem [thread:$0]  (!%p1573_p11), %s1908_s2, 2048, %s1566_s19, [#allocation6], %s1464_s25, %s1464_s25, %s1465_s26  }
  0x36   : > { %s1910_s5 = sld [smem:[#allocation20_spill]] }
  0x3c   : > { %s1265_s21 = scalar_lea.hbm %s1910_s5, 2048 }
  0x3d   : > { %p1266_p1 = scmp.ne.s32.totalorder %s1910_s5, %s1265_s21  ;;  %p1272_p10 = scmp.lt.u32.totalorder %s1265_s21, %s1910_s5 }
  0x3f   : > { %p1268_p2 = pnand %p1266_p1, %p1589_p13 }
  0x41   : > { %p1269_p6 = pneg %p1268_p2 }
  0x43   : > { %p1274_p3 = pnand %p1272_p10, %p1269_p6 }
  0x45   : > { %1277 = shalt.err (!%p1274_p3)
}
  0x46   : > { %s1278_s19 = scalar_lea.vmem %s1577_s22, 2048  ;;  %p1286_p12 = scmp.lt.s32.totalorder %s1577_s22, %s1577_s22 }
  0x47   : > { %p1279_p5 = scmp.ne.s32.totalorder %s1577_s22, %s1278_s19  ;;  %p1287_p0 = scmp.lt.s32.totalorder %s1278_s19, %s1278_s19 }
  0x49   : > { %p1281_p7 = pnand %p1279_p5, %p1589_p13  ;;  %p1288_p1 = por %p1287_p0, %p1286_p12 }
  0x4b   : > { %p1282_p9 = pneg %p1281_p7 }
  0x4d   : > { %p1289_p2 = pnand %p1288_p1, %p1282_p9 }
  0x4f   : > { %1292 = shalt.err (!%p1289_p2)
}
  0x50   : > { %1164 = dma.hbm_to_vmem [thread:$0]  (!%p1573_p11), %s1910_s5, 2048, %s1577_s22, [#allocation9], %s1464_s25, %s1464_s25, %s1465_s26  }
  0x51   : > { %s1911_s6 = sld [smem:[#allocation21_spill]] }
  0x57   : > { %s1293_s28 = scalar_lea.hbm %s1911_s6, 2048 }
  0x58   : > { %p1294_p6 = scmp.ne.s32.totalorder %s1911_s6, %s1293_s28  ;;  %p1300_p5 = scmp.lt.u32.totalorder %s1293_s28, %s1911_s6 }
  0x5a   : > { %p1296_p10 = pnand %p1294_p6, %p1589_p13 }
  0x5c   : > { %p1297_p3 = pneg %p1296_p10 }
  0x5e   : > { %p1302_p7 = pnand %p1300_p5, %p1297_p3 }
  0x60   : > { %1305 = shalt.err (!%p1302_p7)
}
  0x61   : > { %s1306_s19 = scalar_lea.vmem %s304_s24, 2048  ;;  %p1314_p1 = scmp.lt.s32.totalorder %s304_s24, %s304_s24 }
  0x62   : > { %p1307_p9 = scmp.ne.s32.totalorder %s304_s24, %s1306_s19  ;;  %p1315_p2 = scmp.lt.s32.totalorder %s1306_s19, %s1306_s19 }
  0x64   : > { %p1309_p12 = pnand %p1307_p9, %p1589_p13  ;;  %p1316_p4 = por %p1315_p2, %p1314_p1 }
  0x66   : > { %p1310_p0 = pneg %p1309_p12 }
  0x68   : > { %p1317_p8 = pnand %p1316_p4, %p1310_p0 }
  0x6a   : > { %1320 = shalt.err (!%p1317_p8)
}
  0x6b   : > { %1167 = dma.hbm_to_vmem [thread:$0]  (!%p1573_p11), %s1911_s6, 2048, %s304_s24, [#allocation9], %s1464_s25, %s1464_s25, %s1465_s26  }
  0x6c   : > { %s1662_s14 = sadd.s32 1, %s1459_s12   ;;  %s36_s30 = sadd.s32 1, %s1455_s11 }
  0x6d   : > { %s33_s20 = ssub.s32 %s1459_s12, %s1662_s14  ;;  %p43_p8 = scmp.ne.s32.totalorder %s1455_s11, %s1451_s10 }
  0x6e   : > { %p34_p4 = scmp.eq.s32.totalorder %s33_s20, 0  ;;  %p44_p13 = scmp.eq.s32.totalorder %s1459_s12, 0 }
  0x6f   : > { %p1182_p6 = scmp.lt.s32.totalorder %s1459_s12, 2  ;;  %p1912_p3 = scmp.eq.s32.totalorder %s1543_s13, 1 }
  0x70   : > { %s1672_s16 = scalar_select %p34_p4, %s1455_s11, %s36_s30  }
  0x71   : > { %p45_p10 = por %p44_p13, %p43_p8  ;;  %p1676_p5 = por %p1912_p3, %p43_p8 }
  0x72   : > { %s323_s28 = sand.u32 1, %s1455_s11   ;;  %s892_s29 = sshll.u32 %s1459_s12, 7 }
  0x73   : > { %s1913_s27 = scalar_select %p1676_p5, 1, 0 }
  0x74   : > { %s1682_s24 = sshll.u32 %s323_s28, 3  ;;  %s1687_s18 = scalar_lea.hbm %s1881_s0, %s892_s29 }
  0x75   : > { %s327_s21 = scalar_lea.vmem [#allocation2], %s1682_s24  ;;  %p1690_p11 = pnand %p1182_p6, %p45_p10 }
  0x76   : > { %s334_s23 = sshll.u32 %s327_s21, 4  ;;  %s1699_s20 = scalar_lea.hbm %s1882_s1, %s892_s29  ;;  %s1694_s23 = int_to_ptr.vmem [resolvable:$true] %s334_s23 }
  0x77   : > { %s324_s30 = scalar_lea.sflag [#allocation3], %s323_s28  ;;  %s1321_s25 = scalar_lea.hbm %s1687_s18, 128 }
  0x78   : > { %p1322_p7 = scmp.ne.s32.totalorder %s1687_s18, %s1321_s25  ;;  %p1323_p9 = pneg %p1690_p11 }
  0x79   : > { %s1326_s2 = scalar_lea.hbm %s1881_s0, 256  ;;  %p1327_p1 = scmp.lt.u32.totalorder %s1687_s18, %s1881_s0 }
  0x7a   : > { %p1324_p12 = pnand %p1323_p9, %p1322_p7  ;;  %p1328_p2 = scmp.lt.u32.totalorder %s1326_s2, %s1321_s25 }
  0x7b   : > { %p1330_p8 = scmp.lt.u32.totalorder %s1321_s25, %s1687_s18 }
  0x7c   : > { %p1325_p0 = pneg %p1324_p12  ;;  %p1329_p4 = por %p1328_p2, %p1327_p1 }
  0x7e   : > { %p1331_p13 = por %p1330_p8, %p1329_p4 }
  0x80   : > { %p1332_p6 = pnand %p1331_p13, %p1325_p0 }
  0x82   : > { %1335 = shalt.err (!%p1332_p6)
}
  0x83   : > { %s1336_s28 = scalar_lea.vmem %s1694_s23, 128  ;;  %s1466_s29 = smov [#allocation2]  }
  0x84   : > { %p1337_p10 = scmp.ne.s32.totalorder %s1694_s23, %s1336_s28  ;;  %s1341_s22 = sshll.u32 %s1466_s29, 4  ;;  %s1342_s22 = int_to_ptr.vmem [resolvable:$false] %s1341_s22 }
  0x85   : > { %s1343_s5 = scalar_lea.vmem %s1342_s22, 256  ;;  %p1344_p12 = scmp.lt.s32.totalorder %s1694_s23, %s1342_s22 }
  0x86   : > { %p1339_p3 = pnand %p1337_p10, %p1323_p9  ;;  %p1345_p1 = scmp.lt.s32.totalorder %s1343_s5, %s1336_s28 }
  0x88   : > { %p1340_p7 = pneg %p1339_p3  ;;  %p1346_p2 = por %p1345_p1, %p1344_p12 }
  0x8a   : > { %p1347_p4 = pnand %p1346_p2, %p1340_p7 }
  0x8c   : > { %1350 = shalt.err (!%p1347_p4)
}
  0x8d   : > { %1171 = dma.hbm_to_vmem [thread:$0]  (!%p1690_p11), %s1687_s18, 128, %s1694_s23, %s324_s30  }
  0x8e   : > { %s341_s2 = sand.u32 1, %s1459_s12   ;;  %s345_s6 = scalar_lea.vmem [#allocation5], %s1682_s24 }
  0x8f   : > { %s352_s9 = sshll.u32 %s345_s6, 4  ;;  %s342_s25 = scalar_lea.sflag [#allocation6], %s341_s2  ;;  %s353_s9 = int_to_ptr.vmem [resolvable:$true] %s352_s9 }
  0x90   : > { %s1351_s26 = scalar_lea.hbm %s1699_s20, 128  ;;  %s1356_s29 = scalar_lea.hbm %s1882_s1, 256 }
  0x91   : > { %p1352_p0 = scmp.ne.s32.totalorder %s1699_s20, %s1351_s26  ;;  %p1357_p6 = scmp.lt.u32.totalorder %s1699_s20, %s1882_s1 }
  0x92   : > { %p1358_p10 = scmp.lt.u32.totalorder %s1356_s29, %s1351_s26  ;;  %p1360_p7 = scmp.lt.u32.totalorder %s1351_s26, %s1699_s20 }
  0x93   : > { %p1354_p8 = pnand %p1352_p0, %p1323_p9 }
  0x94   : > { %p1359_p3 = por %p1358_p10, %p1357_p6 }
  0x95   : > { %p1355_p13 = pneg %p1354_p8 }
  0x96   : > { %p1361_p12 = por %p1360_p7, %p1359_p3 }
  0x98   : > { %p1362_p1 = pnand %p1361_p12, %p1355_p13 }
  0x9a   : > { %1365 = shalt.err (!%p1362_p1)
}
  0x9b   : > { %s1366_s24 = scalar_lea.vmem %s353_s9, 128  ;;  %s1467_s18 = smov [#allocation5]  }
  0x9c   : > { %p1367_p2 = scmp.ne.s32.totalorder %s353_s9, %s1366_s24  ;;  %s1371_s23 = sshll.u32 %s1467_s18, 4  ;;  %s1372_s23 = int_to_ptr.vmem [resolvable:$false] %s1371_s23 }
  0x9d   : > { %s1373_s30 = scalar_lea.vmem %s1372_s23, 256  ;;  %p1374_p8 = scmp.lt.s32.totalorder %s353_s9, %s1372_s23 }
  0x9e   : > { %p1369_p4 = pnand %p1367_p2, %p1323_p9  ;;  %p1375_p5 = scmp.lt.s32.totalorder %s1373_s30, %s1366_s24 }
  0xa0   : > { %p1370_p0 = pneg %p1369_p4  ;;  %p1376_p6 = por %p1375_p5, %p1374_p8 }
  0xa2   : > { %p1377_p10 = pnand %p1376_p6, %p1370_p0 }
  0xa4   : > { %1380 = shalt.err (!%p1377_p10)
}
  0xa5   : > { %1174 = dma.hbm_to_vmem [thread:$0]  (!%p1690_p11), %s1699_s20, 128, %s353_s9, %s342_s25  }
  0xa6   : > { %p1915_p13 = scmp.ne.s32.totalorder %s1906_s17, 0 }
  0xa7   : > { %s1750_s2 = sand.u32 (!%p1915_p13), 1, %s1451_s10   ;;  %p1916_p5 = scmp.ne.s32.totalorder (!%p1915_p13), %s1903_s15, 0 }
  0xa8   : > { %361 = sbr.rel (%p1915_p13) target bundleno = 864 (0x360), region = 56  ;;  %s1753_s6 = sshll.u32 (!%p1915_p13), %s1750_s2, 3 }
  0xa9   : > { %s364_s26 = scalar_lea.sflag (!%p1915_p13), [#allocation3], %s1750_s2  ;;  %s367_s21 = scalar_lea.vmem (!%p1915_p13), [#allocation2], %s1753_s6 }
  0xaf   : > { %1426 = dma.done.wait (%p1916_p5), %s364_s26, 128  }
  0xb0   : > { %1428 = vsyncadd (%p1916_p5), %s364_s26, 4294967168  ;;  %s372_s17 = sand.u32 1, %s1543_s13   ;;  %s376_s20 = scalar_lea.vmem [#allocation5], %s1753_s6 }
  0xb1   : > { %s373_s19 = scalar_lea.sflag [#allocation6], %s372_s17 }
  0xb2   : > { %1430 = dma.done.wait (%p1916_p5), %s373_s19, 128  }
  0xb3   : > { %1432 = vsyncadd (%p1916_p5), %s373_s19, 4294967168  ;;  %p1917_p11 = scmp.eq.s32.totalorder %s1543_s13, 0 }
  0xb5   : > { %1434 = dma.done.wait (%p1917_p11), [#allocation6], 2048   ;;  %p1918_p9 = pmov %p1917_p11 }
  0xb7   : > { %1436 = vsyncadd (%p1918_p9), [#allocation6], 4294965248  ;;  %p1919_p3 = pmov %p1918_p9 }
  0xb9   : > { %1438 = dma.done.wait (%p1919_p3), [#allocation9], 4096   ;;  %p1920_p7 = pmov %p1919_p3 }
  0xba   : > { %v1468_v0 = vmov 0.0|0.0   ;;  %vm1469_vm0 = vmmov 0   ;;  %v1470_v1 = vmov 0.0   ;;  %v431_v2 = vld [vmem:[#allocation7] sm:$0xff]  ;;  %v432_v3 = vld [vmem:[#allocation7 + $0x8] sm:$0xff]  ;;  %v433_v4 = vld [vmem:[#allocation7 + $0x10] sm:$0xff] }
  0xbb   : > { %1440 = vsyncadd (%p1920_p7), [#allocation9], 4294963200  ;;  %1068 = vmatprep.subr.bf16.mxu0 %v1468_v0  ;;  %995 = vmatprep.mubr.msk.f32.mxu0 %vm1469_vm0, %v1470_v1  ;;  %v1069_v5 = vpack.c.bf16 %v432_v3, %v431_v2  ;;  %v434_v6 = vld [vmem:[#allocation7 + $0x18] sm:$0xff]  ;;  %v435_v8 = vld [vmem:[#allocation7 + $0x20] sm:$0xff]  ;;  %s909_s18 = sshll.u32 %s1543_s13, 7  ;;  %s427_s23 = scalar_lea.vmem [#allocation11], %s1753_s6 }
  0xbc   : > { %1092 = vmatprep.subr.bf16.mxu1 %v1468_v0  ;;  %1030 = vmatprep.mubr.msk.f32.mxu1 %vm1469_vm0, %v1470_v1  ;;  %v1072_v7 = vpack.c.bf16 %v434_v6, %v433_v4  ;;  %v436_v9 = vld [vmem:[#allocation7 + $0x28] sm:$0xff]  ;;  %v437_v11 = vld [vmem:[#allocation7 + $0x30] sm:$0xff]  ;;  %v438_v12 = vld [vmem:[#allocation7 + $0x38] sm:$0xff]  ;;  %s764_s30 = sshll.u32 %s427_s23, 4  ;;  %s1921_s17 = sld [smem:[#allocation22_spill]]  ;;  %s1839_s30 = int_to_ptr.vmem [resolvable:$true] %s764_s30 }
  0xbd   : > { %1070 = vmatpush3.bf16.msra.mxu0 %v1069_v5  ;;  %v1075_v10 = vpack.c.bf16 %v436_v9, %v435_v8  ;;  %v1078_v13 = vpack.c.bf16 %v438_v12, %v437_v11  ;;  %v439_v14 = vld [vmem:[#allocation7 + $0x40] sm:$0xff]  ;;  %v440_v15 = vld [vmem:[#allocation7 + $0x48] sm:$0xff]  ;;  %v441_v17 = vld [vmem:[#allocation7 + $0x50] sm:$0xff]  ;;  %s1381_s15 = scalar_lea.vmem %s1839_s30, 128  ;;  %p1922_p1 = scmp.ne.s32.totalorder %s1913_s27, 0 }
  0xbe   : > { %1071 = vmatprep.subr.bf16.mxu0 %v1468_v0  ;;  %v1081_v16 = vpack.c.bf16 %v440_v15, %v439_v14  ;;  %v442_v18 = vld [vmem:[#allocation7 + $0x58] sm:$0xff]  ;;  %v443_v20 = vld [vmem:[#allocation7 + $0x60] sm:$0xff]  ;;  %v444_v21 = vld [vmem:[#allocation7 + $0x68] sm:$0xff]  ;;  %p1382_p12 = scmp.ne.s32.totalorder %s1839_s30, %s1381_s15  ;;  %s1471_s13 = smov [#allocation11]  }
  0xbf   : > { %v1084_v19 = vpack.c.bf16 %v442_v18, %v441_v17  ;;  %v1087_v22 = vpack.c.bf16 %v444_v21, %v443_v20  ;;  %v445_v23 = vld [vmem:[#allocation7 + $0x70] sm:$0xff]  ;;  %v446_v24 = vld [vmem:[#allocation7 + $0x78] sm:$0xff]  ;;  %v1787_v26 = vld [vmem:[%s367_s21] sm:$0xff]  ;;  %s1385_s6 = sshll.u32 %s1471_s13, 4  ;;  %s1386_s6 = int_to_ptr.vmem [resolvable:$false] %s1385_s6 }
  0xc0   : > { %v1090_v25 = vpack.c.bf16 %v446_v24, %v445_v23  ;;  %v1791_v27 = vld [vmem:[%s376_s20] sm:$0xff]  ;;  %v548_v32 = vld [vmem:[#allocation8] sm:$0xff]  ;;  %v549_v33 = vld [vmem:[#allocation8 + $0x8] sm:$0xff]  ;;  %s751_s20 = scalar_lea.sflag [#allocation4], %s1750_s2  ;;  %p1383_p2 = pnand %p1382_p12, %p1922_p1 }
  0xc1   : > { %1073 = vmatpush3.bf16.msra.mxu0 %v1072_v7  ;;  %v430_v28 = vadd.f32 %v1791_v27, %v1787_v26  ;;  %v564_v34 = vld [vmem:[#allocation10] sm:$0xff]  ;;  %v1093_v35 = vpack.c.bf16 %v549_v33, %v548_v32  ;;  %v565_v36 = vld [vmem:[#allocation10 + $0x8] sm:$0xff]  ;;  %v550_v38 = vld [vmem:[#allocation8 + $0x10] sm:$0xff]  ;;  %s1387_s9 = scalar_lea.vmem %s1386_s6, 256  ;;  %p1388_p0 = scmp.lt.s32.totalorder %s1839_s30, %s1386_s6 }
  0xc2   : > { %1074 = vmatprep.subr.bf16.mxu0 %v1468_v0  ;;  %v1117_v37 = vpack.c.bf16 %v565_v36, %v564_v34  ;;  %v551_v39 = vld [vmem:[#allocation8 + $0x18] sm:$0xff]  ;;  %v566_v40 = vld [vmem:[#allocation10 + $0x10] sm:$0xff]  ;;  %v552_v44 = vld [vmem:[#allocation8 + $0x20] sm:$0xff]  ;;  %s1837_s19 = scalar_lea.hbm %s1921_s17, %s909_s18  ;;  %p1384_p4 = pneg %p1383_p2 }
  0xc3   : > { %1094 = vmatpush3.bf16.msra.mxu1 %v1093_v35  ;;  %v1096_v41 = vpack.c.bf16 %v551_v39, %v550_v38  ;;  %v567_v42 = vld [vmem:[#allocation10 + $0x18] sm:$0xff]  ;;  %v553_v45 = vld [vmem:[#allocation8 + $0x28] sm:$0xff]  ;;  %v568_v46 = vld [vmem:[#allocation10 + $0x20] sm:$0xff]  ;;  %p1389_p8 = scmp.lt.s32.totalorder %s1387_s9, %s1381_s15 }
  0xc4   : > { %1095 = vmatprep.subr.bf16.mxu1 %v1468_v0  ;;  %v1120_v43 = vpack.c.bf16 %v567_v42, %v566_v40  ;;  %v1099_v47 = vpack.c.bf16 %v553_v45, %v552_v44  ;;  %v569_v48 = vld [vmem:[#allocation10 + $0x28] sm:$0xff]  ;;  %v554_v50 = vld [vmem:[#allocation8 + $0x30] sm:$0xff]  ;;  %v555_v51 = vld [vmem:[#allocation8 + $0x38] sm:$0xff] }
  0xc5   : > { %1076 = vmatpush3.bf16.msra.mxu0 %v1075_v10  ;;  %v1123_v49 = vpack.c.bf16 %v569_v48, %v568_v46  ;;  %v570_v52 = vld [vmem:[#allocation10 + $0x30] sm:$0xff]  ;;  %v1102_v53 = vpack.c.bf16 %v555_v51, %v554_v50  ;;  %v571_v54 = vld [vmem:[#allocation10 + $0x38] sm:$0xff]  ;;  %v556_v56 = vld [vmem:[#allocation8 + $0x40] sm:$0xff]  ;;  %p1390_p6 = por %p1389_p8, %p1388_p0 }
  0xc6   : > { %1077 = vmatprep.subr.bf16.mxu0 %v1468_v0  ;;  %v1126_v55 = vpack.c.bf16 %v571_v54, %v570_v52  ;;  %v557_v57 = vld [vmem:[#allocation8 + $0x48] sm:$0xff]  ;;  %v572_v58 = vld [vmem:[#allocation10 + $0x40] sm:$0xff]  ;;  %v558_v61 = vld [vmem:[#allocation8 + $0x50] sm:$0xff] }
  0xc7   : > { %1097 = vmatpush3.bf16.msra.mxu1 %v1096_v41  ;;  %v1105_v59 = vpack.c.bf16 %v557_v57, %v556_v56  ;;  %v573_v60 = vld [vmem:[#allocation10 + $0x48] sm:$0xff]  ;;  %v559_v62 = vld [vmem:[#allocation8 + $0x58] sm:$0xff]  ;;  %v560_v5 = vld [vmem:[#allocation8 + $0x60] sm:$0xff]  ;;  %p1391_p10 = pnand %p1390_p6, %p1384_p4 }
  0xc8   : > { %1098 = vmatprep.subr.bf16.mxu1 %v1468_v0  ;;  %v1129_v63 = vpack.c.bf16 %v573_v60, %v572_v58  ;;  %v575_v2 = vld [vmem:[#allocation10 + $0x58] sm:$0xff]  ;;  %v1108_v3 = vpack.c.bf16 %v559_v62, %v558_v61  ;;  %v561_v6 = vld [vmem:[#allocation8 + $0x68] sm:$0xff]  ;;  %v576_v7 = vld [vmem:[#allocation10 + $0x60] sm:$0xff] }
  0xc9   : > { %1079 = vmatpush3.bf16.msra.mxu0 %v1078_v13  ;;  %v577_v8 = vld [vmem:[#allocation10 + $0x68] sm:$0xff]  ;;  %v1111_v9 = vpack.c.bf16 %v561_v6, %v560_v5  ;;  %v562_v11 = vld [vmem:[#allocation8 + $0x70] sm:$0xff]  ;;  %v563_v12 = vld [vmem:[#allocation8 + $0x78] sm:$0xff] }
  0xca   : > { %1080 = vmatprep.subr.bf16.mxu0 %v1468_v0  ;;  %v1135_v10 = vpack.c.bf16 %v577_v8, %v576_v7  ;;  %v578_v13 = vld [vmem:[#allocation10 + $0x70] sm:$0xff]  ;;  %v579_v14 = vld [vmem:[#allocation10 + $0x78] sm:$0xff]  ;;  %v1114_v15 = vpack.c.bf16 %v563_v12, %v562_v11  ;;  %v904_v35 = vld [vmem:[%s1888_s7] ss:$0 sm:$0xff] }
  0xcb   : > { %1100 = vmatpush3.bf16.msra.mxu1 %v1099_v47 }
  0xcc   : > { %1101 = vmatprep.subr.bf16.mxu1 %v1468_v0 }
  0xcd   : > { %1082 = vmatpush3.bf16.msra.mxu0 %v1081_v16  ;;  %v1138_v16 = vpack.c.bf16 %v579_v14, %v578_v13 }
  0xce   : > { %1083 = vmatprep.subr.bf16.mxu0 %v1468_v0 }
  0xcf   : > { %1103 = vmatpush3.bf16.msra.mxu1 %v1102_v53 }
  0xd0   : > { %1104 = vmatprep.subr.bf16.mxu1 %v1468_v0 }
  0xd1   : > { %1085 = vmatpush3.bf16.msra.mxu0 %v1084_v19 }
  0xd2   : > { %1086 = vmatprep.subr.bf16.mxu0 %v1468_v0 }
  0xd3   : > { %1106 = vmatpush3.bf16.msra.mxu1 %v1105_v59 }
  0xd4   : > { %1107 = vmatprep.subr.bf16.mxu1 %v1468_v0 }
  0xd5   : > { %1088 = vmatpush3.bf16.msra.mxu0 %v1087_v22 }
  0xd6   : > { %1089 = vmatprep.subr.bf16.mxu0 %v1468_v0 }
  0xd7   : > { %1109 = vmatpush3.bf16.msra.mxu1 %v1108_v3 }
  0xd8   : > { %1110 = vmatprep.subr.bf16.mxu1 %v1468_v0 }
  0xd9   : > { %1091 = vmatpush3.bf16.msra.mxu0 %v1090_v25 }
  0xda   : > { %1116 = vmatprep.subr.bf16.mxu0 %v1468_v0 }
  0xdb   : > { %1112 = vmatpush3.bf16.msra.mxu1 %v1111_v9 }
  0xdc   : > { %996 = vmatmul.mubr.f32.vlgmr.msra.gmra.mrb[0].mxu0 %v430_v28  ;;  %1113 = vmatprep.subr.bf16.mxu1 %v1468_v0 }
  0xdd   : > { %1065 = vmatprep.mubr.msk.f32.mxu0 %vm1469_vm0, %v1470_v1  ;;  %1118 = vmatpush3.bf16.msra.mxu0 %v1117_v37  ;;  %v574_v1 = vld [vmem:[#allocation10 + $0x50] sm:$0xff] }
  0xde   : > { %1119 = vmatprep.subr.bf16.mxu0 %v1468_v0  ;;  %v1132_v4 = vpack.c.bf16 %v575_v2, %v574_v1 }
  0xdf   : > { %1115 = vmatpush3.bf16.msra.mxu1 %v1114_v15 }
  0xe1   : > { %1121 = vmatpush3.bf16.msra.mxu0 %v1120_v43 }
  0xe2   : > { %1122 = vmatprep.subr.bf16.mxu0 %v1468_v0 }
  0xe5   : > { %1124 = vmatpush3.bf16.msra.mxu0 %v1123_v49 }
  0xe6   : > { %1125 = vmatprep.subr.bf16.mxu0 %v1468_v0 }
  0xe9   : > { %1127 = vmatpush3.bf16.msra.mxu0 %v1126_v55 }
  0xea   : > { %1128 = vmatprep.subr.bf16.mxu0 %v1468_v0 }
  0xed   : > { %1130 = vmatpush3.bf16.msra.mxu0 %v1129_v63 }
  0xee   : > { %1131 = vmatprep.subr.bf16.mxu0 %v1468_v0 }
  0xf1   : > { %1133 = vmatpush3.bf16.msra.mxu0 %v1132_v4 }
  0xf2   : > { %1134 = vmatprep.subr.bf16.mxu0 %v1468_v0 }
  0xf5   : > { %1136 = vmatpush3.bf16.msra.mxu0 %v1135_v10 }
  0xf6   : > { %1137 = vmatprep.subr.bf16.mxu0 %v1468_v0  ;;  %v903_v0 = vld [vmem:[%s1885_s4] ss:$0 sm:$0xff] }
  0xf9   : > { %1139 = vmatpush3.bf16.msra.mxu0 %v1138_v16 }
 0x1af   : > { %v1798_v29 = vpop.f32.mrb[0].mxu0 }
 0x1b0   : > { %517 = vadd.xlane.f32.xlu0 %v1798_v29  ;;  %v997_v30 = vpop.f32.mrb[1].mxu0  ;;  %v519_v31 = vmul.f32 %v1798_v29, %v1798_v29 }
 0x1b1   : > { %v902_v30 = vld [vmem:[%s1884_s3] ss:$0 sm:$0xff] }
 0x1b4   : > { %520 = vadd.xlane.f32.xlu0 %v519_v31 }
 0x23d   : > { %v518_v17 = vpop.xlane.xlu0 %517 }
 0x23e   : > { %v522_v18 = vmul.f32 0.125, %v518_v17 }
 0x240   : > { %v524_v20 = vmul.f32 %v522_v18, %v522_v18  ;;  %v527_v25 = vsub.f32 %v1798_v29, %v522_v18  ;;  %v906_v29 = vld [vmem:[%s1889_s8] ss:$0 sm:$0xff] }
 0x241   : > { %v521_v19 = vpop.xlane.xlu0 %520 }
 0x242   : > { %v523_v21 = vmul.f32 0.125, %v521_v19 }
 0x244   : > { %v525_v22 = vsub.f32 %v523_v21, %v524_v20 }
 0x246   : > { %v526_v23 = vmax.f32 %v525_v22, 0.0 }
 0x248   : > { %v528_v24 = vadd.f32 1e-05, %v526_v23 }
 0x24a   : > { %1227 = vrsqrt.f32 %v528_v24 }
 0x254   : > { %v1228_v28 = vpop.eup %1227 }
 0x255   : > { %v530_v31 = vmul.f32 %v1228_v28, %v527_v25 }
 0x257   : > { %v538_v32 = vmul.f32 %v902_v30, %v530_v31 }
 0x259   : > { %v546_v33 = vadd.f32 %v903_v0, %v538_v32 }
 0x25b   : > { %v547_v34 = vmax.f32 %v546_v33, 0.0 }
 0x25d   : > { %1031 = vmatmul.mubr.f32.vlgmr.msra.gmra.mrb[0].mxu1 %v547_v34  ;;  %1066 = vmatmul.mubr.f32.vlgmr.msra.gmra.mrb[2].mxu0 %v547_v34 }
 0x330   : > { %v653_v36 = vpop.f32.mrb[0].mxu1  ;;  %v736_v37 = vpop.f32.mrb[2].mxu0 }
 0x331   : > { %v654_v38 = vadd.f32 %v904_v35, %v653_v36  ;;  %v737_v39 = vadd.f32 %v906_v29, %v736_v37  ;;  %v1032_v40 = vpop.f32.mrb[1].mxu1  ;;  %v1067_v41 = vpop.f32.mrb[3].mxu0 }
 0x333   : > { %v905_v42 = vmul.f32 -1.442695, %v654_v38  ;;  %v907_v43 = vmul.f32 -1.442695, %v737_v39 }
 0x335   : > { %1229 = vpow2.f32 %v905_v42 }
 0x336   : > { %1231 = vpow2.f32 %v907_v43 }
 0x33f   : > { %v1230_v44 = vpop.eup %1229 }
 0x340   : > { %v1232_v45 = vpop.eup %1231  ;;  %v660_v46 = vadd.f32 1.0, %v1230_v44 }
 0x341   : > { %v743_v47 = vadd.f32 1.0, %v1232_v45 }
 0x342   : > { %1233 = vrcp.f32 %v660_v46 }
 0x343   : > { %1235 = vrcp.f32 %v743_v47 }
 0x34c   : > { %v1234_v48 = vpop.eup %1233 }
 0x34d   : > { %v1236_v49 = vpop.eup %1235  ;;  %v746_v50 = vmul.f32 %v1234_v48, %v1787_v26 }
 0x34e   : > { %v747_v51 = vmul.f32 %v1236_v49, %v1791_v27 }
 0x350   : > { %v748_v52 = vadd.f32 %v747_v51, %v746_v50 }
 0x352   : > { %749 = vst [vmem:[%s427_s23] sm:$0xff] %v748_v52 }
 0x353   : > { %1394 = shalt.err (!%p1391_p10)
}
 0x354   : > { %s1395_s2 = scalar_lea.hbm %s1837_s19, 128  ;;  %s1399_s29 = scalar_lea.hbm %s1921_s17, 256 }
 0x355   : > { %p1396_p13 = scmp.ne.s32.totalorder %s1837_s19, %s1395_s2  ;;  %p1400_p9 = scmp.lt.u32.totalorder %s1837_s19, %s1921_s17 }
 0x356   : > { %p1401_p3 = scmp.lt.u32.totalorder %s1399_s29, %s1395_s2  ;;  %p1403_p12 = scmp.lt.u32.totalorder %s1395_s2, %s1837_s19 }
 0x357   : > { %p1397_p5 = pnand %p1396_p13, %p1922_p1 }
 0x358   : > { %p1402_p7 = por %p1401_p3, %p1400_p9 }
 0x359   : > { %p1398_p11 = pneg %p1397_p5 }
 0x35a   : > { %p1404_p2 = por %p1403_p12, %p1402_p7 }
 0x35c   : > { %p1405_p4 = pnand %p1404_p2, %p1398_p11 }
 0x35e   : > { %1408 = shalt.err (!%p1405_p4)
}
 0x35f   : > { %1156 = dma.vmem_to_hbm [thread:$0]  (%p1922_p1), %s1839_s30, 128, %s1837_s19, %s751_s20  }
 0x360 PF: > { %s1923_s24 = sld [smem:[#allocation17_spill]]  ;;  %s1924_s18 = sld [smem:[#allocation18_spill]] }
 0x361   : > { %p1926_p8 = scmp.ge.s32.totalorder %s1459_s12, 2 }
 0x366   : > { %s776_s23 = sand.u32 1, %s1923_s24   ;;  %p1925_p0 = scmp.ne.s32.totalorder %s1924_s18, 0 }
 0x367   : > { %s777_s26 = scalar_lea.sflag [#allocation4], %s776_s23 }
 0x368   : > { %p1176_p6 = pnand %p1926_p8, %p1925_p0 }
 0x36a   : > { %1442 = dma.done.wait (!%p1176_p6), %s777_s26, 128  }
 0x36b   : > { %1444 = vsyncadd (!%p1176_p6), %s777_s26, 4294967168  ;;  %p26_p10 = scmp.ge.s32.totalorder %s1662_s14, 4   ;;  %s1927_s30 = smov %s1451_s10 }
 0x36c   : > { %s1928_s10 = smov %s1455_s11  ;;  %s1929_s11 = smov %s1672_s16 }
 0x36d   : > { %s1930_s12 = smov %s1662_s14  ;;  %28 = sbr.rel (!%p26_p10) target bundleno = 13 (0xd), region = 126 }
 0x374   :  { %782 = vsyncpa [#allocation3], 1 }
 0x375   :  { %784 = vsyncpa [#allocation3 + $0x1], 1 }
 0x376   :  { %785 = vsyncpa [#allocation6], 1 }
 0x377   :  { %787 = vsyncpa [#allocation6 + $0x1], 1 }
 0x378   :  { %788 = vsyncpa [#allocation9], 1 }
 0x379   :  { %789 = vsyncpa [#allocation4], 1 }
 0x37a   :  { %791 = vsyncpa [#allocation4 + $0x1], 1 }

</bundles_post_ra>
